<compile_context>
chip_gen: v7x
topology: tpu7x:2x2x1
jax: 0.10.0
libtpu: 0.0.40
codegen_flags: <defaults>
</compile_context>

<pallas_src>
import functools

import jax
import jax.numpy as jnp
from jax.experimental import pallas as pl
from jax.experimental.pallas import tpu as pltpu


def _round_up(x, m):
    return ((x + m - 1) // m) * m


def mlp_kernel(x_ref, w1_ref, b1_ref, w2_ref, b2_ref, w3_ref, b3_ref, o_ref):
    cdt = w1_ref.dtype                       # MXU-input dtype (f32 default, bf16 option)
    x = x_ref[...].astype(cdt)
    # Linear(n_inputs, 11) + ReLU   (f32 accumulate, f32 bias / ReLU)
    h = jnp.dot(x, w1_ref[...], preferred_element_type=jnp.float32) + b1_ref[...]
    h = jnp.maximum(h, 0.0).astype(cdt)
    # Linear(11, 11) + ReLU
    h = jnp.dot(h, w2_ref[...], preferred_element_type=jnp.float32) + b2_ref[...]
    h = jnp.maximum(h, 0.0).astype(cdt)
    # Linear(11, n_outputs) — written lane-tight (exactly n_out columns)
    o_ref[...] = (jnp.dot(h, w3_ref[...], preferred_element_type=jnp.float32)
                  + b3_ref[...]).astype(o_ref.dtype)


def prepare_params(params, compute_dtype=jnp.float32):
    """One-time prep (out of the hot path): transpose PyTorch (out,in) weights to
    (in,out); pad ONLY the tiny hidden dim (11 -> 128).  Input (K) and output
    (n_out) dims stay un-padded so the per-row HBM traffic is lane-tight."""
    (w1, b1), (w2, b2), (w3, b3) = params
    n_in, hid, n_out = w1.shape[1], w1.shape[0], w3.shape[0]
    Hp = _round_up(hid, 128)
    ph = Hp - hid

    arrays = dict(
        w1=jnp.pad(w1.T.astype(compute_dtype), ((0, 0), (0, ph))),    # (n_in, Hp)
        b1=jnp.pad(b1.astype(jnp.float32), (0, ph)).reshape(1, Hp),
        w2=jnp.pad(w2.T.astype(compute_dtype), ((0, ph), (0, ph))),   # (Hp, Hp)
        b2=jnp.pad(b2.astype(jnp.float32), (0, ph)).reshape(1, Hp),
        w3=jnp.pad(w3.T.astype(compute_dtype), ((0, ph), (0, 0))),    # (Hp, n_out)
        b3=b3.astype(jnp.float32).reshape(1, n_out),
    )
    meta = dict(n_in=n_in, n_out=n_out, Hp=Hp)
    return arrays, meta


@functools.partial(jax.jit, static_argnames=("n_in", "n_out", "Hp", "block_batch"))
def _forward_impl(x, w1, b1, w2, b2, w3, b3, *, n_in, n_out, Hp, block_batch):
    B = x.shape[0]
    x2d = x.reshape(B, -1)                   # nn.Flatten: metadata-only under jit
    assert x2d.shape[1] == n_in, (x2d.shape, n_in)

    # Batch tile: multiple of 8 (or the whole batch when B <= 8); guarantee >= 2
    # grid steps when possible so both v7x TensorCores get work.
    if B <= 8:
        tb = B
    else:
        tb = min(_round_up(block_batch, 8), max(8, _round_up(pl.cdiv(B, 2), 8)))
    grid = (pl.cdiv(B, tb),)

    w_bytes = sum(a.size * a.dtype.itemsize for a in (w1, w2, w3, b1, b2, b3))
    cost = pl.CostEstimate(
        flops=2 * B * (n_in * Hp + Hp * Hp + Hp * n_out),
        transcendentals=0,
        bytes_accessed=(B * n_in * x2d.dtype.itemsize   # lane-tight input read
                        + B * n_out * 4                 # lane-tight output write
                        + w_bytes),                     # weights loaded once
    )

    return pl.pallas_call(
        mlp_kernel,
        out_shape=jax.ShapeDtypeStruct((B, n_out), jnp.float32),
        grid=grid,
        in_specs=[
            pl.BlockSpec((tb, n_in), lambda i: (i, 0)),   # x: streamed per batch tile
            pl.BlockSpec((n_in, Hp), lambda i: (0, 0)),   # weights/biases: VMEM-resident
            pl.BlockSpec((1, Hp), lambda i: (0, 0)),
            pl.BlockSpec((Hp, Hp), lambda i: (0, 0)),
            pl.BlockSpec((1, Hp), lambda i: (0, 0)),
            pl.BlockSpec((Hp, n_out), lambda i: (0, 0)),
            pl.BlockSpec((1, n_out), lambda i: (0, 0)),
        ],
        out_specs=pl.BlockSpec((tb, n_out), lambda i: (i, 0)),   # lane-tight output
        compiler_params=pltpu.CompilerParams(dimension_semantics=("parallel",)),
        cost_estimate=cost,
    )(x2d, w1, b1, w2, b2, w3, b3)


def neural_network_forward(x, prepped, block_batch=2048):
    """x: any shape (B, ...); flattened from dim 1, like nn.Flatten()."""
    arrays, meta = prepped
    return _forward_impl(x, arrays["w1"], arrays["b1"], arrays["w2"], arrays["b2"],
                         arrays["w3"], arrays["b3"], block_batch=block_batch, **meta)


def init_params(key, n_inputs, n_outputs, hidden=11):
    # Deterministic PyTorch-style uniform(-1/sqrt(fan_in), 1/sqrt(fan_in)) init.
    ks = jax.random.split(key, 6)

    def lin(kw, kb, fan_in, fan_out):
        bound = 1.0 / jnp.sqrt(jnp.float32(fan_in))
        w = jax.random.uniform(kw, (fan_out, fan_in), jnp.float32, -bound, bound)
        b = jax.random.uniform(kb, (fan_out,), jnp.float32, -bound, bound)
        return w, b

    return (lin(ks[0], ks[1], n_inputs, hidden),
            lin(ks[2], ks[3], hidden, hidden),
            lin(ks[4], ks[5], hidden, n_outputs))


def _reference(x, params):
    (w1, b1), (w2, b2), (w3, b3) = params
    xr = x.reshape(x.shape[0], -1)
    h = jnp.maximum(xr @ w1.T + b1, 0.0)
    h = jnp.maximum(h @ w2.T + b2, 0.0)
    return h @ w3.T + b3


if __name__ == "__main__":
    key = jax.random.PRNGKey(0)
    k_x, k_p, k_x2 = jax.random.split(key, 3)

    # Small example input: batch=2, channels=4, spatial=4x4 -> n_inputs = 64
    B, C, H, W = 2, 4, 4, 4
    n_inputs = C * H * W
    n_outputs = 5

    params = init_params(k_p, n_inputs, n_outputs)
    prepped = prepare_params(params)          # exact f32 path (PyTorch-equivalent)

    # 1) Tiny batch (single full-extent tile).
    x = jax.random.normal(k_x, (B, C, H, W), jnp.float32)
    out = jax.block_until_ready(neural_network_forward(x, prepped))
    assert out.shape == (B, n_outputs)
    assert jnp.allclose(out, _reference(x, params), atol=1e-4, rtol=1e-4)

    # 2) Larger batch not divisible by the tile: exercises grid > 1 (both v7x TCs)
    #    and the masked ragged last tile (no batch padding pass).
    B2 = 50
    x2 = jax.random.normal(k_x2, (B2, C, H, W), jnp.float32)
    out2 = jax.block_until_ready(neural_network_forward(x2, prepped))
    assert out2.shape == (B2, n_outputs)
    assert jnp.allclose(out2, _reference(x2, params), atol=1e-4, rtol=1e-4)

    print("KERNEL_OK")
</pallas_src>

<mosaic_0001>
module attributes {stable_mosaic.version = 11 : i64} {
  func.func @mlp_kernel(%arg0: i32, %arg1: memref<2x64xf32, #tpu.memory_space<vmem>>, %arg2: memref<64x128xf32, #tpu.memory_space<vmem>>, %arg3: memref<1x128xf32, #tpu.memory_space<vmem>>, %arg4: memref<128x128xf32, #tpu.memory_space<vmem>>, %arg5: memref<1x128xf32, #tpu.memory_space<vmem>>, %arg6: memref<128x5xf32, #tpu.memory_space<vmem>>, %arg7: memref<1x5xf32, #tpu.memory_space<vmem>>, %arg8: memref<2x5xf32, #tpu.memory_space<vmem>>) attributes {dimension_semantics = [#tpu.dimension_semantics<parallel>], iteration_bounds = array<i64: 1>, scalar_prefetch = 0 : i64, scratch_operands = 0 : i64, tpu.core_type = #tpu.core_type<tc>, window_params = [{transform_indices = @transform_0, window_bounds = array<i64: 2, 64>}, {pipeline_mode = #tpu.pipeline_mode<synchronous>, transform_indices = @transform_1, window_bounds = array<i64: 64, 128>}, {pipeline_mode = #tpu.pipeline_mode<synchronous>, transform_indices = @transform_2, window_bounds = array<i64: 1, 128>}, {pipeline_mode = #tpu.pipeline_mode<synchronous>, transform_indices = @transform_3, window_bounds = array<i64: 128, 128>}, {pipeline_mode = #tpu.pipeline_mode<synchronous>, transform_indices = @transform_4, window_bounds = array<i64: 1, 128>}, {pipeline_mode = #tpu.pipeline_mode<synchronous>, transform_indices = @transform_5, window_bounds = array<i64: 128, 5>}, {pipeline_mode = #tpu.pipeline_mode<synchronous>, transform_indices = @transform_6, window_bounds = array<i64: 1, 5>}, {transform_indices = @transform_7, window_bounds = array<i64: 2, 5>}]} {
    %c0 = arith.constant 0 : index
    %c0_0 = arith.constant 0 : index
    %0 = vector.load %arg1[%c0, %c0_0] : memref<2x64xf32, #tpu.memory_space<vmem>>, vector<2x64xf32>
    %c0_1 = arith.constant 0 : index
    %c0_2 = arith.constant 0 : index
    %1 = vector.load %arg2[%c0_1, %c0_2] : memref<64x128xf32, #tpu.memory_space<vmem>>, vector<64x128xf32>
    %cst = arith.constant dense<0.000000e+00> : vector<2x128xf32>
    %2 = tpu.matmul %0, %1, %cst {dimension_numbers = #tpu.dot_dimension_numbers<[1], [0], [0], [1], [0, 0, 1, 1], [], []>} : vector<2x64xf32>, vector<64x128xf32>, vector<2x128xf32> -> vector<2x128xf32>
    %c0_3 = arith.constant 0 : index
    %c0_4 = arith.constant 0 : index
    %3 = vector.load %arg3[%c0_3, %c0_4] : memref<1x128xf32, #tpu.memory_space<vmem>>, vector<1x128xf32>
    %4 = vector.broadcast %3 : vector<1x128xf32> to vector<2x128xf32>
    %5 = arith.addf %2, %4 : vector<2x128xf32>
    %cst_5 = arith.constant 0.000000e+00 : f32
    %6 = vector.broadcast %cst_5 : f32 to vector<2x128xf32>
    %7 = arith.maximumf %5, %6 : vector<2x128xf32>
    %c0_6 = arith.constant 0 : index
    %c0_7 = arith.constant 0 : index
    %8 = vector.load %arg4[%c0_6, %c0_7] : memref<128x128xf32, #tpu.memory_space<vmem>>, vector<128x128xf32>
    %cst_8 = arith.constant dense<0.000000e+00> : vector<2x128xf32>
    %9 = tpu.matmul %7, %8, %cst_8 {dimension_numbers = #tpu.dot_dimension_numbers<[1], [0], [0], [1], [0, 0, 1, 1], [], []>} : vector<2x128xf32>, vector<128x128xf32>, vector<2x128xf32> -> vector<2x128xf32>
    %c0_9 = arith.constant 0 : index
    %c0_10 = arith.constant 0 : index
    %10 = vector.load %arg5[%c0_9, %c0_10] : memref<1x128xf32, #tpu.memory_space<vmem>>, vector<1x128xf32>
    %11 = vector.broadcast %10 : vector<1x128xf32> to vector<2x128xf32>
    %12 = arith.addf %9, %11 : vector<2x128xf32>
    %cst_11 = arith.constant 0.000000e+00 : f32
    %13 = vector.broadcast %cst_11 : f32 to vector<2x128xf32>
    %14 = arith.maximumf %12, %13 : vector<2x128xf32>
    %c0_12 = arith.constant 0 : index
    %c0_13 = arith.constant 0 : index
    %15 = vector.load %arg6[%c0_12, %c0_13] : memref<128x5xf32, #tpu.memory_space<vmem>>, vector<128x5xf32>
    %cst_14 = arith.constant dense<0.000000e+00> : vector<2x5xf32>
    %16 = tpu.matmul %14, %15, %cst_14 {dimension_numbers = #tpu.dot_dimension_numbers<[1], [0], [0], [1], [0, 0, 1, 1], [], []>} : vector<2x128xf32>, vector<128x5xf32>, vector<2x5xf32> -> vector<2x5xf32>
    %c0_15 = arith.constant 0 : index
    %c0_16 = arith.constant 0 : index
    %17 = vector.load %arg7[%c0_15, %c0_16] : memref<1x5xf32, #tpu.memory_space<vmem>>, vector<1x5xf32>
    %18 = vector.broadcast %17 : vector<1x5xf32> to vector<2x5xf32>
    %19 = arith.addf %16, %18 : vector<2x5xf32>
    %c0_17 = arith.constant 0 : index
    %c0_18 = arith.constant 0 : index
    %20 = vector.load %arg8[%c0_17, %c0_18] : memref<2x5xf32, #tpu.memory_space<vmem>>, vector<2x5xf32>
    tpu.vector_store %arg8[%c0_17, %c0_18], %19 {strides = array<i32>} : memref<2x5xf32, #tpu.memory_space<vmem>>, vector<2x5xf32>,
    return
  }
  func.func @transform_0(%arg0: i32) -> (i32, i32) {
    %c0_i32 = arith.constant 0 : i32
    %c0_i32_0 = arith.constant 0 : i32
    return %arg0, %c0_i32 : i32, i32
  }
  func.func @transform_1(%arg0: i32) -> (i32, i32) {
    %c0_i32 = arith.constant 0 : i32
    %c0_i32_0 = arith.constant 0 : i32
    %c0_i32_1 = arith.constant 0 : i32
    return %c0_i32, %c0_i32_0 : i32, i32
  }
  func.func @transform_2(%arg0: i32) -> (i32, i32) {
    %c0_i32 = arith.constant 0 : i32
    %c0_i32_0 = arith.constant 0 : i32
    %c0_i32_1 = arith.constant 0 : i32
    return %c0_i32, %c0_i32_0 : i32, i32
  }
  func.func @transform_3(%arg0: i32) -> (i32, i32) {
    %c0_i32 = arith.constant 0 : i32
    %c0_i32_0 = arith.constant 0 : i32
    %c0_i32_1 = arith.constant 0 : i32
    return %c0_i32, %c0_i32_0 : i32, i32
  }
  func.func @transform_4(%arg0: i32) -> (i32, i32) {
    %c0_i32 = arith.constant 0 : i32
    %c0_i32_0 = arith.constant 0 : i32
    %c0_i32_1 = arith.constant 0 : i32
    return %c0_i32, %c0_i32_0 : i32, i32
  }
  func.func @transform_5(%arg0: i32) -> (i32, i32) {
    %c0_i32 = arith.constant 0 : i32
    %c0_i32_0 = arith.constant 0 : i32
    %c0_i32_1 = arith.constant 0 : i32
    return %c0_i32, %c0_i32_0 : i32, i32
  }
  func.func @transform_6(%arg0: i32) -> (i32, i32) {
    %c0_i32 = arith.constant 0 : i32
    %c0_i32_0 = arith.constant 0 : i32
    %c0_i32_1 = arith.constant 0 : i32
    return %c0_i32, %c0_i32_0 : i32, i32
  }
  func.func @transform_7(%arg0: i32) -> (i32, i32) {
    %c0_i32 = arith.constant 0 : i32
    %c0_i32_0 = arith.constant 0 : i32
    return %arg0, %c0_i32 : i32, i32
  }
}

</mosaic_0001>

<bundles_post_ra>
// kernel: _forward_impl.1
= control target key start
LH: loop header
LB: loop body
LE: loop exit
PB: predicated region body
PF: predicated region fallthrough
CT: control target
= control target key end

     0   :  { %12 = vsyncpa [#allocation3], 0  ;;  %s789_s0 = inlined_call_operand.vmem [shape: f32[2,64], index: 0, kind: input, shape index: {}]   ;;  %s790_s1 = inlined_call_operand.hbm [shape: f32[64,128], index: 1, kind: input, shape index: {}]   ;;  %s791_s2 = inlined_call_operand.vmem [shape: f32[1,128], index: 2, kind: input, shape index: {}]   ;;  %s792_s3 = inlined_call_operand.vmem [shape: f32[128,128], index: 3, kind: input, shape index: {}]   ;;  %s793_s4 = inlined_call_operand.vmem [shape: f32[1,128], index: 4, kind: input, shape index: {}]   ;;  %s794_s5 = inlined_call_operand.vmem [shape: f32[128,5], index: 5, kind: input, shape index: {}]   ;;  %s795_s6 = inlined_call_operand.vmem [shape: f32[1,5], index: 6, kind: input, shape index: {}]   ;;  %s796_s7 = inlined_call_operand.hbm [shape: f32[2,5], index: 7, kind: output, shape index: {}]  }
   0x1   :  { %13 = vsyncpa [#allocation4], 0  ;;  %s587_s24 = smov [#allocation2]   ;;  %s539_s28 = scalar_lea.hbm %s790_s1, 1024 }
   0x2   :  { %s21_s25 = sshll.u32 %s587_s24, 4  ;;  %p540_p0 = scmp.ne.s32.totalorder %s790_s1, %s539_s28  ;;  %s22_s25 = int_to_ptr.vmem [resolvable:$true] %s21_s25 }
   0x3   :  { %p543_p1 = scmp.lt.u32.totalorder %s539_s28, %s790_s1 }
   0x5   :  { %p545_p2 = pnand %p543_p1, %p540_p0 }
   0x7   :  { %548 = shalt.err (!%p545_p2)
}
   0x8   :  { %s549_s10 = scalar_lea.vmem %s22_s25, 1024  ;;  %p554_p4 = scmp.lt.s32.totalorder %s22_s25, %s22_s25 }
   0x9   :  { %p550_p3 = scmp.ne.s32.totalorder %s22_s25, %s549_s10  ;;  %p555_p5 = scmp.lt.s32.totalorder %s549_s10, %s549_s10 }
   0xb   :  { %p556_p6 = por %p555_p5, %p554_p4 }
   0xd   :  { %p557_p7 = pnand %p556_p6, %p550_p3 }
   0xf   :  { %560 = shalt.err (!%p557_p7)
}
  0x10   :  { %s588_s11 = smov 128   ;;  %s589_s12 = smov 8  }
  0x11   :  { %27 = dma.hbm_to_vmem [thread:$0]  %s790_s1, 1024, %s22_s25, [#allocation3], %s588_s11, %s588_s11, %s589_s12  }
  0x12   :  { %583 = dma.done.wait [#allocation3], 1024  }
  0x13   :  { %584 = vsyncadd [#allocation3], 4294966272  ;;  %v590_v0 = vmov 0.0|0.0   ;;  %vm591_vm0 = vmmov 0   ;;  %v592_v1 = vmov 0.0   ;;  %v42_v2 = vld [vmem:[#allocation2] sm:$0xff] }
  0x14   :  { %472 = vmatprep.subr.bf16.mxu0 %v590_v0  ;;  %399 = vmatprep.mubr.msk.f32.mxu0 %vm591_vm0, %v592_v1  ;;  %v43_v3 = vld [vmem:[#allocation2 + $0x8] sm:$0xff]  ;;  %v44_v4 = vld [vmem:[#allocation2 + $0x10] sm:$0xff]  ;;  %v45_v6 = vld [vmem:[#allocation2 + $0x18] sm:$0xff]  ;;  %vm57_vm1 = vcmask 523264   ;;  %s593_s10 = smov [#allocation5]   ;;  %vm319_vm2 = vcmask 33792  }
  0x15   :  { %484 = vmatprep.subr.bf16.mxu1 %v590_v0  ;;  %434 = vmatprep.mubr.msk.f32.mxu1 %vm591_vm0, %v592_v1  ;;  %v473_v5 = vpack.c.bf16 %v43_v3, %v42_v2  ;;  %v476_v7 = vpack.c.bf16 %v45_v6, %v44_v4  ;;  %v132_v8 = vld [vmem:[%s792_s3] sm:$0xff]  ;;  %v133_v9 = vld [vmem:[%s792_s3 + $0x8] sm:$0xff]  ;;  %v134_v10 = vld [vmem:[%s792_s3 + $0x10] sm:$0xff]  ;;  %s327_s11 = sshll.u32 %s593_s10, 4  ;;  %s328_s11 = int_to_ptr.vmem [resolvable:$true] %s327_s11 }
  0x16   :  { %v46_v11 = vld [vmem:[#allocation2 + $0x20] sm:$0xff]  ;;  %v47_v12 = vld [vmem:[#allocation2 + $0x28] sm:$0xff]  ;;  %v485_v13 = vpack.c.bf16 %v133_v9, %v132_v8  ;;  %v135_v14 = vld [vmem:[%s792_s3 + $0x18] sm:$0xff]  ;;  %p566_p9 = scmp.lt.s32.totalorder %s328_s11, %s328_s11 }
  0x17   :  { %474 = vmatpush3.bf16.msra.mxu0 %v473_v5  ;;  %v488_v15 = vpack.c.bf16 %v135_v14, %v134_v10  ;;  %v479_v16 = vpack.c.bf16 %v47_v12, %v46_v11  ;;  %v136_v17 = vld [vmem:[%s792_s3 + $0x20] sm:$0xff]  ;;  %v137_v18 = vld [vmem:[%s792_s3 + $0x28] sm:$0xff]  ;;  %v48_v19 = vld [vmem:[#allocation2 + $0x30] sm:$0xff] }
  0x18   :  { %475 = vmatprep.subr.bf16.mxu0 %v590_v0  ;;  %486 = vmatpush3.bf16.msra.mxu1 %v485_v13  ;;  %v49_v20 = vld [vmem:[#allocation2 + $0x38] sm:$0xff]  ;;  %v491_v21 = vpack.c.bf16 %v137_v18, %v136_v17  ;;  %v138_v23 = vld [vmem:[%s792_s3 + $0x30] sm:$0xff]  ;;  %v41_v26 = vld [vmem:[%s789_s0] sm:$0x3] }
  0x19   :  { %487 = vmatprep.subr.bf16.mxu1 %v590_v0  ;;  %v482_v22 = vpack.c.bf16 %v49_v20, %v48_v19  ;;  %v139_v24 = vld [vmem:[%s792_s3 + $0x38] sm:$0xff]  ;;  %v140_v27 = vld [vmem:[%s792_s3 + $0x40] sm:$0xff]  ;;  %v141_v28 = vld [vmem:[%s792_s3 + $0x48] sm:$0xff] }
  0x1a   :  { %v494_v25 = vpack.c.bf16 %v139_v24, %v138_v23  ;;  %v497_v29 = vpack.c.bf16 %v141_v28, %v140_v27  ;;  %v142_v30 = vld [vmem:[%s792_s3 + $0x50] sm:$0xff]  ;;  %v143_v31 = vld [vmem:[%s792_s3 + $0x58] sm:$0xff]  ;;  %v144_v33 = vld [vmem:[%s792_s3 + $0x60] sm:$0xff] }
  0x1b   :  { %477 = vmatpush3.bf16.msra.mxu0 %v476_v7  ;;  %v500_v32 = vpack.c.bf16 %v143_v31, %v142_v30  ;;  %v145_v34 = vld [vmem:[%s792_s3 + $0x68] sm:$0xff]  ;;  %v146_v36 = vld [vmem:[%s792_s3 + $0x70] sm:$0xff]  ;;  %v147_v37 = vld [vmem:[%s792_s3 + $0x78] sm:$0xff] }
  0x1c   :  { %478 = vmatprep.subr.bf16.mxu0 %v590_v0  ;;  %489 = vmatpush3.bf16.msra.mxu1 %v488_v15  ;;  %v503_v35 = vpack.c.bf16 %v145_v34, %v144_v33  ;;  %v506_v38 = vpack.c.bf16 %v147_v37, %v146_v36  ;;  %v226_v39 = vld [vmem:[%s794_s5] sm:$0xff]  ;;  %v227_v40 = vld [vmem:[%s794_s5 + $0x8] sm:$0xff]  ;;  %v228_v41 = vld [vmem:[%s794_s5 + $0x10] sm:$0xff] }
  0x1d   :  { %490 = vmatprep.subr.bf16.mxu1 %v590_v0  ;;  %v509_v42 = vpack.c.bf16 %v227_v40, %v226_v39  ;;  %v229_v43 = vld [vmem:[%s794_s5 + $0x18] sm:$0xff]  ;;  %v230_v45 = vld [vmem:[%s794_s5 + $0x20] sm:$0xff]  ;;  %v231_v46 = vld [vmem:[%s794_s5 + $0x28] sm:$0xff] }
  0x1e   :  { %v512_v44 = vpack.c.bf16 %v229_v43, %v228_v41  ;;  %v515_v47 = vpack.c.bf16 %v231_v46, %v230_v45  ;;  %v232_v48 = vld [vmem:[%s794_s5 + $0x30] sm:$0xff]  ;;  %v233_v49 = vld [vmem:[%s794_s5 + $0x38] sm:$0xff]  ;;  %v234_v51 = vld [vmem:[%s794_s5 + $0x40] sm:$0xff] }
  0x1f   :  { %480 = vmatpush3.bf16.msra.mxu0 %v479_v16  ;;  %v518_v50 = vpack.c.bf16 %v233_v49, %v232_v48  ;;  %v235_v52 = vld [vmem:[%s794_s5 + $0x48] sm:$0xff]  ;;  %v236_v54 = vld [vmem:[%s794_s5 + $0x50] sm:$0xff]  ;;  %v237_v55 = vld [vmem:[%s794_s5 + $0x58] sm:$0xff] }
  0x20   :  { %481 = vmatprep.subr.bf16.mxu0 %v590_v0  ;;  %492 = vmatpush3.bf16.msra.mxu1 %v491_v21  ;;  %v521_v53 = vpack.c.bf16 %v235_v52, %v234_v51  ;;  %v524_v56 = vpack.c.bf16 %v237_v55, %v236_v54  ;;  %v238_v57 = vld [vmem:[%s794_s5 + $0x60] sm:$0xff]  ;;  %v239_v58 = vld [vmem:[%s794_s5 + $0x68] sm:$0xff]  ;;  %v240_v2 = vld [vmem:[%s794_s5 + $0x70] sm:$0xff] }
  0x21   :  { %493 = vmatprep.subr.bf16.mxu1 %v590_v0  ;;  %v527_v59 = vpack.c.bf16 %v239_v58, %v238_v57  ;;  %v336_v60 = vld [vmem:[%s791_s2] ss:$0 sm:$0xff]  ;;  %v241_v3 = vld [vmem:[%s794_s5 + $0x78] sm:$0xff]  ;;  %s561_s5 = scalar_lea.vmem %s328_s11, 32 }
  0x22   :  { %v530_v4 = vpack.c.bf16 %v241_v3, %v240_v2  ;;  %v339_v9 = vld [vmem:[%s795_s6] ss:$0 sm:$0xff]  ;;  %p562_p8 = scmp.ne.s32.totalorder %s328_s11, %s561_s5  ;;  %p567_p10 = scmp.lt.s32.totalorder %s561_s5, %s561_s5 }
  0x23   :  { %483 = vmatpush3.bf16.msra.mxu0 %v482_v22 }
  0x24   :  { %508 = vmatprep.subr.bf16.mxu0 %v590_v0  ;;  %495 = vmatpush3.bf16.msra.mxu1 %v494_v25  ;;  %p568_p11 = por %p567_p10, %p566_p9 }
  0x25   :  { %496 = vmatprep.subr.bf16.mxu1 %v590_v0 }
  0x26   :  { %400 = vmatmul.mubr.msk.f32.vlgmr.msra.gmra.mrb[0].mxu0 %vm57_vm1, %v41_v26  ;;  %p569_p12 = pnand %p568_p11, %p562_p8 }
  0x27   :  { %469 = vmatprep.mubr.msk.f32.mxu0 %vm591_vm0, %v592_v1  ;;  %510 = vmatpush3.bf16.msra.mxu0 %v509_v42 }
  0x28   :  { %498 = vmatpush3.bf16.msra.mxu1 %v497_v29  ;;  %511 = vmatprep.subr.bf16.mxu0 %v590_v0 }
  0x29   :  { %499 = vmatprep.subr.bf16.mxu1 %v590_v0 }
  0x2b   :  { %513 = vmatpush3.bf16.msra.mxu0 %v512_v44 }
  0x2c   :  { %501 = vmatpush3.bf16.msra.mxu1 %v500_v32  ;;  %514 = vmatprep.subr.bf16.mxu0 %v590_v0 }
  0x2d   :  { %502 = vmatprep.subr.bf16.mxu1 %v590_v0 }
  0x2f   :  { %516 = vmatpush3.bf16.msra.mxu0 %v515_v47 }
  0x30   :  { %504 = vmatpush3.bf16.msra.mxu1 %v503_v35  ;;  %517 = vmatprep.subr.bf16.mxu0 %v590_v0 }
  0x31   :  { %505 = vmatprep.subr.bf16.mxu1 %v590_v0 }
  0x33   :  { %519 = vmatpush3.bf16.msra.mxu0 %v518_v50 }
  0x34   :  { %507 = vmatpush3.bf16.msra.mxu1 %v506_v38  ;;  %520 = vmatprep.subr.bf16.mxu0 %v590_v0 }
  0x37   :  { %522 = vmatpush3.bf16.msra.mxu0 %v521_v53 }
  0x38   :  { %523 = vmatprep.subr.bf16.mxu0 %v590_v0 }
  0x3b   :  { %525 = vmatpush3.bf16.msra.mxu0 %v524_v56 }
  0x3c   :  { %526 = vmatprep.subr.bf16.mxu0 %v590_v0 }
  0x3f   :  { %528 = vmatpush3.bf16.msra.mxu0 %v527_v59 }
  0x40   :  { %529 = vmatprep.subr.bf16.mxu0 %v590_v0  ;;  %v338_v0 = vld [vmem:[%s793_s4] ss:$0 sm:$0xff] }
  0x43   :  { %531 = vmatpush3.bf16.msra.mxu0 %v530_v4 }
  0xf9   :  { %v127_v61 = vpop.f32.mrb[0].mxu0 }
  0xfa   :  { %v128_v62 = vadd.f32 %v336_v60, %v127_v61  ;;  %v401_v63 = vpop.f32.mrb[1].mxu0 }
  0xfc   :  { %v131_v1 = vmax.f32 %v128_v62, 0.0 }
  0xfe   :  { %435 = vmatmul.mubr.f32.vlgmr.msra.gmra.mrb[0].mxu1 %v131_v1 }
 0x1d1   :  { %v221_v5 = vpop.f32.mrb[0].mxu1 }
 0x1d2   :  { %v222_v6 = vadd.f32 %v338_v0, %v221_v5  ;;  %v436_v7 = vpop.f32.mrb[1].mxu1 }
 0x1d4   :  { %v225_v8 = vmax.f32 %v222_v6, 0.0 }
 0x1d6   :  { %470 = vmatmul.mubr.f32.vlgmr.msra.gmra.mrb[2].mxu0 %v225_v8 }
 0x2a9   :  { %v315_v10 = vpop.f32.mrb[2].mxu0 }
 0x2aa   :  { %v316_v11 = vadd.f32 %v339_v9, %v315_v10  ;;  %v471_v12 = vpop.f32.mrb[3].mxu0 }
 0x2ac   :  { %320 = vst.msk [vmem:[#allocation5] sm:$0x3] %vm319_vm2, %v316_v11 }
 0x2ad   :  { %572 = shalt.err (!%p569_p12)
}
 0x2ae   :  { %s573_s13 = scalar_lea.hbm %s796_s7, 32 }
 0x2af   :  { %p574_p13 = scmp.ne.s32.totalorder %s796_s7, %s573_s13  ;;  %p577_p0 = scmp.lt.u32.totalorder %s573_s13, %s796_s7 }
 0x2b1   :  { %p579_p1 = pnand %p577_p0, %p574_p13 }
 0x2b3   :  { %582 = shalt.err (!%p579_p1)
}
 0x2b4   :  { %330 = dma.vmem_to_hbm [thread:$0]  %s328_s11, 32, %s796_s7, [#allocation4]  }
 0x2b5   :  { %585 = dma.done.wait [#allocation4], 32  }
 0x2b6   :  { %586 = vsyncadd [#allocation4], 4294967264 }
 0x2b7   :  { %334 = vsyncpa [#allocation3], 1 }
 0x2b8   :  { %335 = vsyncpa [#allocation4], 1 }

</bundles_post_ra>
